<compile_context>
chip_gen: v5e
topology: v5e:2x2
jax: 0.10.0
libtpu: 0.0.40
codegen_flags: <defaults>
</compile_context>

<pallas_src>
import functools

import jax
import jax.numpy as jnp
import numpy as np
from jax.experimental import pallas as pl
from jax.experimental.pallas import tpu as pltpu


def _view_kernel(x_ref, pooled_ref, body_ref, *, hw, n_ch):
    # x_ref:      (bt, C*H*W)  flat per-image CHW volume (row-major == torch .view order)
    # pooled_ref: (bt, feats)  adaptive_avg_pool2d((1,1)) token (feats == C)
    # body_ref:   (bt, C*H*W)  verbatim copy of x (== x.view(b, -1, feats) regrouping)

    # Bulk copy at lane offset 0: full-width, unmasked vector stores (at most one masked edge
    # tile when C*H*W % 128 != 0).  Mosaic streams this vreg-by-vreg; no rotates, no merges.
    body_ref[...] = x_ref[...]

    # adaptive_avg_pool2d((1,1)) == per-channel mean over H*W, accumulated in f32.
    inv_hw = jnp.float32(1.0 / hw)
    for ci in range(n_ch):  # static unroll: every slice / store has a static offset
        xc = x_ref[:, ci * hw:(ci + 1) * hw].astype(jnp.float32)   # (bt, hw)
        m = jnp.sum(xc, axis=-1, keepdims=True) * inv_hw           # (bt, 1), f32 accumulation
        pooled_ref[:, ci:ci + 1] = m.astype(pooled_ref.dtype)
    # TODO(synk): for very large channel counts (C >> 1k) switch the static unroll to a
    # lax.fori_loop(unroll=8) with dynamic-lane stores to bound trace/compile size.


def view_forward(x, feats, *, assemble=True):
    """Pallas implementation of View(feats).forward for NCHW input x."""
    B, C, H, W = x.shape
    chw = C * H * W
    # torch.cat([pooled (b,1,C), x.view(b,-1,feats)], dim=1) requires feats == C.
    assert C == feats, "concatenation in the reference requires feats == C"
    rows = chw // feats
    dsize = jnp.dtype(x.dtype).itemsize

    # Pure layout: row-major flatten of CHW, identical ordering to torch's contiguous .view.
    x_flat = x.reshape(B, chw)

    # ---- VMEM budget & batch tile -------------------------------------------------------
    try:
        vmem_cap = int(getattr(pltpu.get_tpu_info(), "vmem_capacity_bytes"))
    except Exception:
        vmem_cap = 64 * 1024 * 1024                      # v7x per-TC capacity (the smallest)
    vmem_limit = max(16 * 1024 * 1024, min((vmem_cap * 3) // 4, 96 * 1024 * 1024))
    block_budget = min(vmem_limit // 2, 28 * 1024 * 1024)  # double-buffered in+out blocks

    sublane = max(8, 32 // dsize)                        # 8 f32 / 16 bf16 / 32 int8 packing
    per_row = 2 * (2 * chw + feats) * dsize              # in + (body + pooled) blocks, x2 bufs
    bt_cap = max(1, block_budget // per_row)
    if bt_cap >= B:
        bt = B
    else:
        bt = min(B, max(sublane, (bt_cap // sublane) * sublane))
    steps = -(-B // bt)                                  # cdiv: tail block is masked by Pallas
    # Keep >= 2 independent grid steps when the batch allows it so the "parallel" axis can be
    # split across v7x's two TensorCores.
    if steps < 2 and B >= 2 * sublane:
        bt = -(-((B + 1) // 2) // sublane) * sublane
        steps = -(-B // bt)
    # TODO(synk): if a single image ever exceeds the VMEM budget (huge C*H*W), add a second
    # grid axis tiling the flat row.

    kernel = functools.partial(_view_kernel, hw=H * W, n_ch=C)

    pooled, body = pl.pallas_call(
        kernel,
        out_shape=(jax.ShapeDtypeStruct((B, feats), x.dtype),
                   jax.ShapeDtypeStruct((B, chw), x.dtype)),
        grid=(steps,),
        in_specs=[pl.BlockSpec((bt, chw), lambda b: (b, 0))],
        out_specs=(pl.BlockSpec((bt, feats), lambda b: (b, 0)),
                   pl.BlockSpec((bt, chw), lambda b: (b, 0))),
        compiler_params=pltpu.CompilerParams(
            dimension_semantics=("parallel",),           # batch tiles are independent
            vmem_limit_bytes=vmem_limit,
        ),
        cost_estimate=pl.CostEstimate(
            flops=B * chw,                                        # pooling adds
            transcendentals=0,
            bytes_accessed=(B * chw + B * (chw + feats)) * dsize,  # 1x read + 1x write
        ),
    )(x_flat)

    if not assemble:
        return pooled, body

    # Layout glue only (the relayout to a feats-minor 3-D array is required by the reference
    # output shape regardless of what the kernel emits): [pooled | x.view(b,-1,feats)] on dim 1.
    return jnp.concatenate([pooled[:, None, :], body.reshape(B, rows, feats)], axis=1)


if __name__ == "__main__":
    key = jax.random.PRNGKey(0)
    B, C, H, W = 2, 4, 16, 16
    feats = C  # required by the reference concat semantics

    x = jax.random.normal(key, (B, C, H, W), dtype=jnp.float32)

    out = jax.block_until_ready(view_forward(x, feats))

    # Pure-JAX reference.
    pooled_ref = jnp.mean(x, axis=(2, 3))[:, None, :]          # (B, 1, C)
    pre_ref = x.reshape(B, -1, feats)                          # (B, rows, feats)
    ref = jnp.concatenate([pooled_ref, pre_ref], axis=1)       # (B, 1+rows, feats)

    assert out.shape == ref.shape, (out.shape, ref.shape)
    assert np.allclose(np.asarray(out), np.asarray(ref), atol=1e-5, rtol=1e-5)

    print("KERNEL_OK")
</pallas_src>

<mosaic_0001>
module attributes {stable_mosaic.version = 11 : i64} {
  func.func @_view_kernel(%arg0: i32, %arg1: memref<2x1024xf32, #tpu.memory_space<vmem>>, %arg2: memref<2x4xf32, #tpu.memory_space<vmem>>, %arg3: memref<2x1024xf32, #tpu.memory_space<vmem>>) attributes {dimension_semantics = [#tpu.dimension_semantics<parallel>], iteration_bounds = array<i64: 1>, scalar_prefetch = 0 : i64, scratch_operands = 0 : i64, tpu.core_type = #tpu.core_type<tc>, window_params = [{transform_indices = @transform_0, window_bounds = array<i64: 2, 1024>}, {transform_indices = @transform_1, window_bounds = array<i64: 2, 4>}, {transform_indices = @transform_2, window_bounds = array<i64: 2, 1024>}]} {
    %c0 = arith.constant 0 : index
    %c0_0 = arith.constant 0 : index
    %0 = vector.load %arg1[%c0, %c0_0] : memref<2x1024xf32, #tpu.memory_space<vmem>>, vector<2x1024xf32>
    %c0_1 = arith.constant 0 : index
    %c0_2 = arith.constant 0 : index
    %1 = vector.load %arg3[%c0_1, %c0_2] : memref<2x1024xf32, #tpu.memory_space<vmem>>, vector<2x1024xf32>
    tpu.vector_store %arg3[%c0_1, %c0_2], %0 {strides = array<i32>} : memref<2x1024xf32, #tpu.memory_space<vmem>>, vector<2x1024xf32>,
    %c0_3 = arith.constant 0 : index
    %c0_4 = arith.constant 0 : index
    %2 = vector.load %arg1[%c0_3, %c0_4] : memref<2x1024xf32, #tpu.memory_space<vmem>>, vector<2x256xf32>
    %cst = arith.constant dense<0.000000e+00> : vector<2xf32>
    %3 = vector.multi_reduction <add>, %2, %cst [1] : vector<2x256xf32> to vector<2xf32>
    %4 = vector.shape_cast %3 : vector<2xf32> to vector<2x1xf32>
    %cst_5 = arith.constant 3.906250e-03 : f32
    %5 = vector.broadcast %cst_5 : f32 to vector<2x1xf32>
    %6 = arith.mulf %4, %5 : vector<2x1xf32>
    %c0_6 = arith.constant 0 : index
    %c0_7 = arith.constant 0 : index
    %7 = vector.load %arg2[%c0_6, %c0_7] : memref<2x4xf32, #tpu.memory_space<vmem>>, vector<2x1xf32>
    tpu.vector_store %arg2[%c0_6, %c0_7], %6 {strides = array<i32>} : memref<2x4xf32, #tpu.memory_space<vmem>>, vector<2x1xf32>,
    %c0_8 = arith.constant 0 : index
    %c256 = arith.constant 256 : index
    %8 = vector.load %arg1[%c0_8, %c256] : memref<2x1024xf32, #tpu.memory_space<vmem>>, vector<2x256xf32>
    %cst_9 = arith.constant dense<0.000000e+00> : vector<2xf32>
    %9 = vector.multi_reduction <add>, %8, %cst_9 [1] : vector<2x256xf32> to vector<2xf32>
    %10 = vector.shape_cast %9 : vector<2xf32> to vector<2x1xf32>
    %cst_10 = arith.constant 3.906250e-03 : f32
    %11 = vector.broadcast %cst_10 : f32 to vector<2x1xf32>
    %12 = arith.mulf %10, %11 : vector<2x1xf32>
    %c0_11 = arith.constant 0 : index
    %c1 = arith.constant 1 : index
    %13 = vector.load %arg2[%c0_11, %c1] : memref<2x4xf32, #tpu.memory_space<vmem>>, vector<2x1xf32>
    tpu.vector_store %arg2[%c0_11, %c1], %12 {strides = array<i32>} : memref<2x4xf32, #tpu.memory_space<vmem>>, vector<2x1xf32>,
    %c0_12 = arith.constant 0 : index
    %c512 = arith.constant 512 : index
    %14 = vector.load %arg1[%c0_12, %c512] : memref<2x1024xf32, #tpu.memory_space<vmem>>, vector<2x256xf32>
    %cst_13 = arith.constant dense<0.000000e+00> : vector<2xf32>
    %15 = vector.multi_reduction <add>, %14, %cst_13 [1] : vector<2x256xf32> to vector<2xf32>
    %16 = vector.shape_cast %15 : vector<2xf32> to vector<2x1xf32>
    %cst_14 = arith.constant 3.906250e-03 : f32
    %17 = vector.broadcast %cst_14 : f32 to vector<2x1xf32>
    %18 = arith.mulf %16, %17 : vector<2x1xf32>
    %c0_15 = arith.constant 0 : index
    %c2 = arith.constant 2 : index
    %19 = vector.load %arg2[%c0_15, %c2] : memref<2x4xf32, #tpu.memory_space<vmem>>, vector<2x1xf32>
    tpu.vector_store %arg2[%c0_15, %c2], %18 {strides = array<i32>} : memref<2x4xf32, #tpu.memory_space<vmem>>, vector<2x1xf32>,
    %c0_16 = arith.constant 0 : index
    %c768 = arith.constant 768 : index
    %20 = vector.load %arg1[%c0_16, %c768] : memref<2x1024xf32, #tpu.memory_space<vmem>>, vector<2x256xf32>
    %cst_17 = arith.constant dense<0.000000e+00> : vector<2xf32>
    %21 = vector.multi_reduction <add>, %20, %cst_17 [1] : vector<2x256xf32> to vector<2xf32>
    %22 = vector.shape_cast %21 : vector<2xf32> to vector<2x1xf32>
    %cst_18 = arith.constant 3.906250e-03 : f32
    %23 = vector.broadcast %cst_18 : f32 to vector<2x1xf32>
    %24 = arith.mulf %22, %23 : vector<2x1xf32>
    %c0_19 = arith.constant 0 : index
    %c3 = arith.constant 3 : index
    %25 = vector.load %arg2[%c0_19, %c3] : memref<2x4xf32, #tpu.memory_space<vmem>>, vector<2x1xf32>
    tpu.vector_store %arg2[%c0_19, %c3], %24 {strides = array<i32>} : memref<2x4xf32, #tpu.memory_space<vmem>>, vector<2x1xf32>,
    return
  }
  func.func @transform_0(%arg0: i32) -> (i32, i32) {
    %c0_i32 = arith.constant 0 : i32
    %c0_i32_0 = arith.constant 0 : i32
    return %arg0, %c0_i32 : i32, i32
  }
  func.func @transform_1(%arg0: i32) -> (i32, i32) {
    %c0_i32 = arith.constant 0 : i32
    %c0_i32_0 = arith.constant 0 : i32
    return %arg0, %c0_i32 : i32, i32
  }
  func.func @transform_2(%arg0: i32) -> (i32, i32) {
    %c0_i32 = arith.constant 0 : i32
    %c0_i32_0 = arith.constant 0 : i32
    return %arg0, %c0_i32 : i32, i32
  }
}

</mosaic_0001>

<bundles_post_ra>
// kernel: tpu_custom_call.1
= control target key start
LH: loop header
LB: loop body
LE: loop exit
PB: predicated region body
PF: predicated region fallthrough
CT: control target
= control target key end

     0   :  { %8 = vsyncpa [#allocation3], 0  ;;  %s240_s0 = inlined_call_operand.hbm [shape: f32[2,1024], index: 0, kind: input, shape index: {}]   ;;  %s241_s1 = inlined_call_operand.hbm [shape: f32[2,4], index: 1, kind: output, shape index: {0}]   ;;  %s242_s2 = inlined_call_operand.hbm [shape: f32[2,1024], index: 2, kind: output, shape index: {1}]  }
   0x1   :  { %9 = vsyncpa [#allocation4], 0 }
   0x2   :  { %10 = vsyncpa [#allocation7], 0  ;;  %s16_s11 = sshll.u32 %s240_s0, 4  ;;  %s205_s12 = smov [#allocation2]   ;;  %s17_s11 = int_to_ptr.hbm [resolvable:$true] %s16_s11 }
   0x3   :  { %s18_s13 = sshll.u32 %s205_s12, 4  ;;  %s19_s13 = int_to_ptr.vmem [resolvable:$true] %s18_s13 }
   0x4   :  { %21 = dma.hbm_to_vmem [thread:$0]  %s17_s11, 256, %s19_s13, [#allocation3]  }
   0x5   :  { %199 = dma.done.wait [#allocation3], 256  }
   0x6   :  { %200 = vsyncadd [#allocation3], 4294967040  ;;  %v30_v0 = vld [vmem:[#allocation2] sm:$0xf]  ;;  %vm37_vm0 = vcmask 1041408   ;;  %s206_s0 = smov [#allocation6]  }
   0x7   :  { %32 = vst [vmem:[#allocation1] ss:$4 sm:$0xff] %v30_v0  ;;  %v46_v1 = vld [vmem:[#allocation2 + $0x4] sm:$0xf]  ;;  %v61_v7 = vld [vmem:[#allocation2 + $0x8] sm:$0xf] }
   0x8   :  { %v76_v13 = vld [vmem:[#allocation2 + $0xc] sm:$0xf]  ;;  %s107_s14 = sshll.u32 %s206_s0, 4  ;;  %s109_s17 = sshll.u32 %s242_s2, 4  ;;  %v26_v24 = vld [vmem:[#allocation2] sm:$0xff]  ;;  %vm44_vm1 = vcmask 1024   ;;  %s108_s14 = int_to_ptr.vmem [resolvable:$true] %s107_s14  ;;  %s110_s17 = int_to_ptr.hbm [resolvable:$true] %s109_s17 }
   0x9   :  { %v27_v25 = vld [vmem:[#allocation2 + $0x8] sm:$0xff]  ;;  %28 = vst [vmem:[#allocation6] sm:$0xff] %v26_v24  ;;  %vm59_vm2 = vcmask 9224   ;;  %vm74_vm3 = vcmask 17424   ;;  %s207_s2 = smov [#allocation5]   ;;  %s98_s21 = sshll.u32 %s241_s1, 4  ;;  %s99_s21 = int_to_ptr.hbm [resolvable:$true] %s98_s21 }
   0xa   :  { %29 = vst [vmem:[#allocation6 + $0x8] sm:$0xff] %v27_v25  ;;  %s96_s18 = sshll.u32 %s207_s2, 4  ;;  %vm89_vm4 = vcmask 25624   ;;  %s97_s18 = int_to_ptr.vmem [resolvable:$true] %s96_s18 }
   0xb   :  { %112 = dma.vmem_to_hbm [thread:$0]  %s108_s14, 256, %s110_s17, [#allocation7]  }
   0xe   :  { %v33_v2 = vld.sshfl [vmem:[#allocation1] sm:$0xff pattern:$0x73625140]  ;;  %v34_v3 = vld.sshfl [vmem:[#allocation1 + $0x8] sm:$0xff pattern:$0x73625140] }
   0xf   :  { %v38_v4 = vsel %vm37_vm0, %v33_v2, 0.0  ;;  %v39_v5 = vsel %vm37_vm0, %v34_v3, 0.0  ;;  %48 = vst [vmem:[#allocation1] ss:$4 sm:$0xff] %v46_v1 }
  0x10   :  { %v40_v6 = vadd.f32 %v39_v5, %v38_v4 }
  0x12   :  { %41 = vadd.xlane.f32.xlu0 %v40_v6 }
  0x16   :  { %v49_v8 = vld.sshfl [vmem:[#allocation1] sm:$0xff pattern:$0x73625140]  ;;  %v50_v9 = vld.sshfl [vmem:[#allocation1 + $0x8] sm:$0xff pattern:$0x73625140] }
  0x17   :  { %v53_v10 = vsel %vm37_vm0, %v49_v8, 0.0  ;;  %v54_v11 = vsel %vm37_vm0, %v50_v9, 0.0  ;;  %63 = vst [vmem:[#allocation1] ss:$4 sm:$0xff] %v61_v7 }
  0x18   :  { %v55_v12 = vadd.f32 %v54_v11, %v53_v10 }
  0x1a   :  { %56 = vadd.xlane.f32.xlu0 %v55_v12 }
  0x1e   :  { %v64_v14 = vld.sshfl [vmem:[#allocation1] sm:$0xff pattern:$0x73625140]  ;;  %v65_v15 = vld.sshfl [vmem:[#allocation1 + $0x8] sm:$0xff pattern:$0x73625140] }
  0x1f   :  { %v68_v16 = vsel %vm37_vm0, %v64_v14, 0.0  ;;  %v69_v17 = vsel %vm37_vm0, %v65_v15, 0.0  ;;  %78 = vst [vmem:[#allocation1] ss:$4 sm:$0xff] %v76_v13 }
  0x20   :  { %v70_v18 = vadd.f32 %v69_v17, %v68_v16 }
  0x22   :  { %71 = vadd.xlane.f32.xlu1 %v70_v18 }
  0x26   :  { %v79_v19 = vld.sshfl [vmem:[#allocation1] sm:$0xff pattern:$0x73625140]  ;;  %v80_v20 = vld.sshfl [vmem:[#allocation1 + $0x8] sm:$0xff pattern:$0x73625140] }
  0x27   :  { %v83_v21 = vsel %vm37_vm0, %v79_v19, 0.0  ;;  %v84_v22 = vsel %vm37_vm0, %v80_v20, 0.0 }
  0x28   :  { %v85_v23 = vadd.f32 %v84_v22, %v83_v21 }
  0x2a   :  { %86 = vadd.xlane.f32.xlu1 %v85_v23 }
  0x85   :  { %v42_v26 = vpop.xlane.xlu0 %41 }
  0x86   :  { %v43_v27 = vmul.f32 0.00390625, %v42_v26 }
  0x88   :  { %45 = vst.msk [vmem:[#allocation5] sm:$0x3] %vm44_vm1, %v43_v27 }
  0x8d   :  { %v57_v28 = vpop.xlane.xlu0 %56 }
  0x8e   :  { %v58_v29 = vmul.f32 0.00390625, %v57_v28 }
  0x90   :  { %60 = vst.msk [vmem:[#allocation5] sm:$0x3] %vm59_vm2, %v58_v29 }
  0x95   :  { %v72_v30 = vpop.xlane.xlu1 %71 }
  0x96   :  { %v73_v31 = vmul.f32 0.00390625, %v72_v30 }
  0x98   :  { %75 = vst.msk [vmem:[#allocation5] sm:$0x3] %vm74_vm3, %v73_v31 }
  0x9d   :  { %v87_v32 = vpop.xlane.xlu1 %86 }
  0x9e   :  { %v88_v33 = vmul.f32 0.00390625, %v87_v32 }
  0xa0   :  { %90 = vst.msk [vmem:[#allocation5] sm:$0x3] %vm89_vm4, %v88_v33 }
  0xa1   :  { %101 = dma.vmem_to_hbm [thread:$0]  %s97_s18, 32, %s99_s21, [#allocation4]  }
  0xa2   :  { %201 = dma.done.wait [#allocation4], 32  }
  0xa3   :  { %202 = vsyncadd [#allocation4], 4294967264 }
  0xa4   :  { %203 = dma.done.wait [#allocation7], 256  }
  0xa5   :  { %204 = vsyncadd [#allocation7], 4294967040 }
  0xa6   :  { %121 = vsyncpa [#allocation3], 1 }
  0xa7   :  { %122 = vsyncpa [#allocation4], 1 }
  0xa8   :  { %123 = vsyncpa [#allocation7], 1 }

</bundles_post_ra>
